<compile_context>
chip_gen: v5e
topology: v5e:2x2
jax: 0.10.0
libtpu: 0.0.40
codegen_flags: <defaults>
</compile_context>

<pallas_src>
import functools

import jax
import jax.numpy as jnp
import numpy as np
from jax import lax
from jax.experimental import pallas as pl
from jax.experimental.pallas import tpu as pltpu


def rwkv_channelmix_kernel(x_ref, wkvr_ref, bkvr_ref, ww_ref, bw_ref,
                           wo_ref, bo_ref, o_ref, *,
                           seq_len, half, hidden_pad, n_embd):
    x = x_ref[...]                                    # (B*T, C) — one row per (batch, time) token
    bt, c = x.shape

    # --- time shift (ZeroPad2d((0,0,1,-1))) on the first C//2 channels, all in VMEM ---
    # Row i of x_prev is token (t-1) of the same batch; rows with t == 0 are zero.
    # Implemented as a tiny (bt, bt) shift-matrix matmul (negligible MXU work, no
    # sublane relayouts, no extra HBM pass for a shifted copy of x).
    row = lax.broadcasted_iota(jnp.int32, (bt, bt), 0)
    col = lax.broadcasted_iota(jnp.int32, (bt, bt), 1)
    shift = jnp.where(((row - col) == 1) & ((row % seq_len) != 0), 1.0, 0.0)
    x_prev = jnp.dot(shift, x, preferred_element_type=jnp.float32)   # (B*T, C)
    lane = lax.broadcasted_iota(jnp.int32, (bt, c), 1)
    x_mix = jnp.where(lane < half, x_prev, x)                        # (B*T, C)

    # --- packed k | v | r projection: one MXU pass instead of three narrow ones ---
    kvr = jnp.dot(x_mix, wkvr_ref[...],
                  preferred_element_type=jnp.float32) + bkvr_ref[...]  # (B*T, 2*Hp + E)
    k = kvr[:, :hidden_pad]                           # (B*T, Hp)  (cols >= hidden are exact zeros)
    v = kvr[:, hidden_pad:2 * hidden_pad]             # (B*T, Hp)
    r = kvr[:, 2 * hidden_pad:2 * hidden_pad + n_embd]  # (B*T, E)

    # --- mish(k) * v  (numerically stable softplus; exp/log/tanh ride the EUP slot) ---
    sp = jnp.where(k > 20.0, k, jnp.log(1.0 + jnp.exp(jnp.minimum(k, 20.0))))
    kv = (k * jnp.tanh(sp)) * v                       # padded columns stay exactly zero

    wkv = jnp.dot(kv, ww_ref[...],
                  preferred_element_type=jnp.float32) + bw_ref[...]   # (B*T, E)

    # sigmoid(r) via the exact tanh identity — EUP tanh, no VPU divide
    sig_r = 0.5 * (jnp.tanh(0.5 * r) + 1.0)
    rwkv = sig_r * wkv                                # (B*T, E)

    out = jnp.dot(rwkv, wo_ref[...],
                  preferred_element_type=jnp.float32) + bo_ref[...]   # (B*T, Do)
    o_ref[...] = out


def rwkv_channelmix(x, params):
    """Wrapper: weight packing / padding in plain JAX (small, once per call here), hot path in Pallas."""
    B, T, C = x.shape
    H = params['wk'].shape[1]          # hidden_sz = 5 * n_embd // 4
    E = params['wr'].shape[1]          # n_embd
    Do = params['wo_adj'].shape[1]

    # shape constraints required for the PyTorch forward to be well-defined (see header)
    assert params['wk'].shape[0] == C and params['wv'].shape[0] == C and params['wr'].shape[0] == C, \
        "n_embd1 / n_attn must equal C so the ad-hoc nn.Linear branch is skipped"
    assert params['ww'].shape == (H, E)
    assert params['wo_adj'].shape[0] == E, "output_adjust expects n_embd-wide input"

    # pad hidden (160) up to a lane multiple (256) -> lane-aligned slices inside the kernel
    Hp = ((H + 127) // 128) * 128
    pad_h = Hp - H
    wk = jnp.pad(params['wk'], ((0, 0), (0, pad_h)))
    bk = jnp.pad(params['bk'], ((0, 0), (0, pad_h)))
    wv = jnp.pad(params['wv'], ((0, 0), (0, pad_h)))
    bv = jnp.pad(params['bv'], ((0, 0), (0, pad_h)))
    wkvr = jnp.concatenate([wk, wv, params['wr']], axis=1)      # (C, 2*Hp + E)
    bkvr = jnp.concatenate([bk, bv, params['br']], axis=1)      # (1, 2*Hp + E)
    ww = jnp.pad(params['ww'], ((0, pad_h), (0, 0)))            # (Hp, E), zero rows for padding

    # free metadata reshape; the time shift itself happens inside the kernel
    x_flat = x.reshape(B * T, C)

    kernel = functools.partial(rwkv_channelmix_kernel,
                               seq_len=T, half=C // 2, hidden_pad=Hp, n_embd=E)

    vmem = pl.BlockSpec(memory_space=pltpu.MemorySpace.VMEM)
    out = pl.pallas_call(
        kernel,
        out_shape=jax.ShapeDtypeStruct((B * T, Do), jnp.float32),
        in_specs=[vmem] * 7,
        out_specs=vmem,
        # single invocation: the whole problem fits trivially in VMEM at these sizes.
    )(x_flat, wkvr, bkvr, ww, params['bw'], params['wo_adj'], params['bo_adj'])
    return out.reshape(B, T, Do)


def reference(x, params):
    """Plain-JAX replica of the torch forward (for verification)."""
    hp = lax.Precision.HIGHEST
    B, T, C = x.shape
    half = C // 2

    xs = jnp.pad(x[:, :-1, :half], ((0, 0), (1, 0), (0, 0)))       # ZeroPad2d((0,0,1,-1))
    xm = jnp.concatenate([xs, x[:, :, half:]], axis=-1)

    k = jnp.matmul(xm, params['wk'], precision=hp) + params['bk']
    v = jnp.matmul(xm, params['wv'], precision=hp) + params['bv']
    r = jnp.matmul(xm, params['wr'], precision=hp) + params['br']

    mish_k = k * jnp.tanh(jax.nn.softplus(k))                       # F.mish
    wkv = jnp.matmul(mish_k * v, params['ww'], precision=hp) + params['bw']
    rwkv = jax.nn.sigmoid(r) * wkv
    out = jnp.matmul(rwkv, params['wo_adj'], precision=hp) + params['bo_adj']
    return out


if __name__ == "__main__":
    B, T = 2, 8
    n_embd = 128                    # output_adjust = nn.Linear(128, 64) forces n_embd == 128
    C = 128                         # n_embd1 == n_attn == C so the ad-hoc Linear branch is skipped
    hidden = 5 * n_embd // 4        # 160
    Do = 64

    key = jax.random.PRNGKey(0)
    ks = jax.random.split(key, 11)
    params = {
        'wk': jax.random.normal(ks[0], (C, hidden), jnp.float32) / np.sqrt(C),
        'bk': 0.01 * jax.random.normal(ks[1], (1, hidden), jnp.float32),
        'wv': jax.random.normal(ks[2], (C, hidden), jnp.float32) / np.sqrt(C),
        'bv': 0.01 * jax.random.normal(ks[3], (1, hidden), jnp.float32),
        'wr': jax.random.normal(ks[4], (C, n_embd), jnp.float32) / np.sqrt(C),
        'br': 0.01 * jax.random.normal(ks[5], (1, n_embd), jnp.float32),
        'ww': jax.random.normal(ks[6], (hidden, n_embd), jnp.float32) / np.sqrt(hidden),
        'bw': 0.01 * jax.random.normal(ks[7], (1, n_embd), jnp.float32),
        'wo_adj': jax.random.normal(ks[8], (n_embd, Do), jnp.float32) / np.sqrt(n_embd),
        'bo_adj': 0.01 * jax.random.normal(ks[9], (1, Do), jnp.float32),
    }
    x = jax.random.normal(ks[10], (B, T, C), jnp.float32)

    out = jax.block_until_ready(rwkv_channelmix(x, params))
    ref = jax.block_until_ready(reference(x, params))

    np.testing.assert_allclose(np.asarray(out), np.asarray(ref), rtol=5e-3, atol=5e-3)
    print("KERNEL_OK")
</pallas_src>

<mosaic_0001>
module attributes {stable_mosaic.version = 11 : i64} {
  func.func @rwkv_channelmix_kernel(%arg0: memref<16x128xf32, #tpu.memory_space<vmem>>, %arg1: memref<128x640xf32, #tpu.memory_space<vmem>>, %arg2: memref<1x640xf32, #tpu.memory_space<vmem>>, %arg3: memref<256x128xf32, #tpu.memory_space<vmem>>, %arg4: memref<1x128xf32, #tpu.memory_space<vmem>>, %arg5: memref<128x64xf32, #tpu.memory_space<vmem>>, %arg6: memref<1x64xf32, #tpu.memory_space<vmem>>, %arg7: memref<16x64xf32, #tpu.memory_space<vmem>>) attributes {dimension_semantics = [], scalar_prefetch = 0 : i64, scratch_operands = 0 : i64, tpu.core_type = #tpu.core_type<tc>} {
    %c0 = arith.constant 0 : index
    %c0_0 = arith.constant 0 : index
    %0 = vector.load %arg0[%c0, %c0_0] : memref<16x128xf32, #tpu.memory_space<vmem>>, vector<16x128xf32>
    %1 = tpu.iota {dimensions = array<i32: 0>} : vector<16x16xi32>
    %2 = tpu.iota {dimensions = array<i32: 1>} : vector<16x16xi32>
    %3 = arith.subi %1, %2 : vector<16x16xi32>
    %c1_i32 = arith.constant 1 : i32
    %4 = vector.broadcast %c1_i32 : i32 to vector<16x16xi32>
    %5 = arith.cmpi eq, %3, %4 : vector<16x16xi32>
    %c8_i32 = arith.constant 8 : i32
    %c0_i32 = arith.constant 0 : i32
    %6 = arith.cmpi eq, %c8_i32, %c0_i32 : i32
    %c1_i32_1 = arith.constant 1 : i32
    %7 = arith.select %6, %c1_i32_1, %c8_i32 : i32
    %8 = vector.broadcast %7 : i32 to vector<16x16xi32>
    %9 = arith.remsi %1, %8 : vector<16x16xi32>
    %c0_i32_2 = arith.constant 0 : i32
    %10 = vector.broadcast %c0_i32_2 : i32 to vector<16x16xi32>
    %11 = arith.cmpi ne, %9, %10 : vector<16x16xi32>
    %c0_i32_3 = arith.constant 0 : i32
    %12 = vector.broadcast %c0_i32_3 : i32 to vector<16x16xi32>
    %13 = arith.cmpi slt, %9, %12 : vector<16x16xi32>
    %c0_i32_4 = arith.constant 0 : i32
    %14 = arith.cmpi slt, %7, %c0_i32_4 : i32
    %15 = vector.broadcast %14 : i1 to vector<16x16xi1>
    %16 = vector.broadcast %15 : vector<16x16xi1> to vector<16x16xi1>
    %17 = arith.xori %13, %16 : vector<16x16xi1>
    %18 = arith.andi %17, %11 : vector<16x16xi1>
    %19 = vector.broadcast %7 : i32 to vector<16x16xi32>
    %20 = arith.addi %9, %19 : vector<16x16xi32>
    %21 = arith.select %18, %20, %9 : vector<16x16xi1>, vector<16x16xi32>
    %c0_i32_5 = arith.constant 0 : i32
    %22 = vector.broadcast %c0_i32_5 : i32 to vector<16x16xi32>
    %23 = arith.cmpi ne, %21, %22 : vector<16x16xi32>
    %24 = arith.andi %5, %23 : vector<16x16xi1>
    %cst = arith.constant 1.000000e+00 : f32
    %cst_6 = arith.constant 0.000000e+00 : f32
    %25 = vector.broadcast %cst : f32 to vector<16x16xf32>
    %26 = vector.broadcast %cst_6 : f32 to vector<16x16xf32>
    %27 = arith.select %24, %25, %26 : vector<16x16xi1>, vector<16x16xf32>
    %cst_7 = arith.constant dense<0.000000e+00> : vector<16x128xf32>
    %28 = tpu.matmul %27, %0, %cst_7 {dimension_numbers = #tpu.dot_dimension_numbers<[1], [0], [0], [1], [0, 0, 1, 1], [], []>} : vector<16x16xf32>, vector<16x128xf32>, vector<16x128xf32> -> vector<16x128xf32>
    %29 = tpu.iota {dimensions = array<i32: 1>} : vector<16x128xi32>
    %c64_i32 = arith.constant 64 : i32
    %30 = vector.broadcast %c64_i32 : i32 to vector<16x128xi32>
    %31 = arith.cmpi slt, %29, %30 : vector<16x128xi32>
    %32 = arith.select %31, %28, %0 : vector<16x128xi1>, vector<16x128xf32>
    %c0_8 = arith.constant 0 : index
    %c0_9 = arith.constant 0 : index
    %33 = vector.load %arg1[%c0_8, %c0_9] : memref<128x640xf32, #tpu.memory_space<vmem>>, vector<128x640xf32>
    %cst_10 = arith.constant dense<0.000000e+00> : vector<16x640xf32>
    %34 = tpu.matmul %32, %33, %cst_10 {dimension_numbers = #tpu.dot_dimension_numbers<[1], [0], [0], [1], [0, 0, 1, 1], [], []>} : vector<16x128xf32>, vector<128x640xf32>, vector<16x640xf32> -> vector<16x640xf32>
    %c0_11 = arith.constant 0 : index
    %c0_12 = arith.constant 0 : index
    %35 = vector.load %arg2[%c0_11, %c0_12] : memref<1x640xf32, #tpu.memory_space<vmem>>, vector<1x640xf32>
    %36 = vector.broadcast %35 : vector<1x640xf32> to vector<16x640xf32>
    %37 = arith.addf %34, %36 : vector<16x640xf32>
    %38 = vector.extract_strided_slice %37 {offsets = [0, 0], sizes = [16, 256], strides = [1, 1]} : vector<16x640xf32> to vector<16x256xf32>
    %39 = vector.extract_strided_slice %37 {offsets = [0, 256], sizes = [16, 256], strides = [1, 1]} : vector<16x640xf32> to vector<16x256xf32>
    %40 = vector.extract_strided_slice %37 {offsets = [0, 512], sizes = [16, 128], strides = [1, 1]} : vector<16x640xf32> to vector<16x128xf32>
    %cst_13 = arith.constant 2.000000e+01 : f32
    %41 = vector.broadcast %cst_13 : f32 to vector<16x256xf32>
    %42 = arith.cmpf ogt, %38, %41 : vector<16x256xf32>
    %cst_14 = arith.constant 2.000000e+01 : f32
    %43 = vector.broadcast %cst_14 : f32 to vector<16x256xf32>
    %44 = arith.minimumf %38, %43 : vector<16x256xf32>
    %45 = math.exp %44 : vector<16x256xf32>
    %cst_15 = arith.constant 1.000000e+00 : f32
    %46 = vector.broadcast %cst_15 : f32 to vector<16x256xf32>
    %47 = arith.addf %46, %45 : vector<16x256xf32>
    %48 = math.log %47 : vector<16x256xf32>
    %49 = arith.select %42, %38, %48 : vector<16x256xi1>, vector<16x256xf32>
    %50 = math.tanh %49 : vector<16x256xf32>
    %51 = arith.mulf %38, %50 : vector<16x256xf32>
    %52 = arith.mulf %51, %39 : vector<16x256xf32>
    %c0_16 = arith.constant 0 : index
    %c0_17 = arith.constant 0 : index
    %53 = vector.load %arg3[%c0_16, %c0_17] : memref<256x128xf32, #tpu.memory_space<vmem>>, vector<256x128xf32>
    %cst_18 = arith.constant dense<0.000000e+00> : vector<16x128xf32>
    %54 = tpu.matmul %52, %53, %cst_18 {dimension_numbers = #tpu.dot_dimension_numbers<[1], [0], [0], [1], [0, 0, 1, 1], [], []>} : vector<16x256xf32>, vector<256x128xf32>, vector<16x128xf32> -> vector<16x128xf32>
    %c0_19 = arith.constant 0 : index
    %c0_20 = arith.constant 0 : index
    %55 = vector.load %arg4[%c0_19, %c0_20] : memref<1x128xf32, #tpu.memory_space<vmem>>, vector<1x128xf32>
    %56 = vector.broadcast %55 : vector<1x128xf32> to vector<16x128xf32>
    %57 = arith.addf %54, %56 : vector<16x128xf32>
    %cst_21 = arith.constant 5.000000e-01 : f32
    %58 = vector.broadcast %cst_21 : f32 to vector<16x128xf32>
    %59 = arith.mulf %58, %40 : vector<16x128xf32>
    %60 = math.tanh %59 : vector<16x128xf32>
    %cst_22 = arith.constant 1.000000e+00 : f32
    %61 = vector.broadcast %cst_22 : f32 to vector<16x128xf32>
    %62 = arith.addf %60, %61 : vector<16x128xf32>
    %cst_23 = arith.constant 5.000000e-01 : f32
    %63 = vector.broadcast %cst_23 : f32 to vector<16x128xf32>
    %64 = arith.mulf %63, %62 : vector<16x128xf32>
    %65 = arith.mulf %64, %57 : vector<16x128xf32>
    %c0_24 = arith.constant 0 : index
    %c0_25 = arith.constant 0 : index
    %66 = vector.load %arg5[%c0_24, %c0_25] : memref<128x64xf32, #tpu.memory_space<vmem>>, vector<128x64xf32>
    %cst_26 = arith.constant dense<0.000000e+00> : vector<16x64xf32>
    %67 = tpu.matmul %65, %66, %cst_26 {dimension_numbers = #tpu.dot_dimension_numbers<[1], [0], [0], [1], [0, 0, 1, 1], [], []>} : vector<16x128xf32>, vector<128x64xf32>, vector<16x64xf32> -> vector<16x64xf32>
    %c0_27 = arith.constant 0 : index
    %c0_28 = arith.constant 0 : index
    %68 = vector.load %arg6[%c0_27, %c0_28] : memref<1x64xf32, #tpu.memory_space<vmem>>, vector<1x64xf32>
    %69 = vector.broadcast %68 : vector<1x64xf32> to vector<16x64xf32>
    %70 = arith.addf %67, %69 : vector<16x64xf32>
    %c0_29 = arith.constant 0 : index
    %c0_30 = arith.constant 0 : index
    %71 = vector.load %arg7[%c0_29, %c0_30] : memref<16x64xf32, #tpu.memory_space<vmem>>, vector<16x64xf32>
    tpu.vector_store %arg7[%c0_29, %c0_30], %70 {strides = array<i32>} : memref<16x64xf32, #tpu.memory_space<vmem>>, vector<16x64xf32>,
    return
  }
}

</mosaic_0001>

<bundles_post_ra>
// kernel: tpu_custom_call.1
= control target key start
LH: loop header
LB: loop body
LE: loop exit
PB: predicated region body
PF: predicated region fallthrough
CT: control target
= control target key end

     0   :  { %12 = vsyncpa [#allocation3], 0  ;;  %s844_s0 = inlined_call_operand.vmem [shape: f32[16,128], index: 0, kind: input, shape index: {}]   ;;  %s845_s1 = inlined_call_operand.hbm [shape: f32[128,640], index: 1, kind: input, shape index: {}]   ;;  %s846_s2 = inlined_call_operand.vmem [shape: f32[1,640], index: 2, kind: input, shape index: {}]   ;;  %s847_s3 = inlined_call_operand.hbm [shape: f32[256,128], index: 3, kind: input, shape index: {}]   ;;  %s848_s4 = inlined_call_operand.vmem [shape: f32[1,128], index: 4, kind: input, shape index: {}]   ;;  %s849_s5 = inlined_call_operand.vmem [shape: f32[128,64], index: 5, kind: input, shape index: {}]   ;;  %s850_s6 = inlined_call_operand.vmem [shape: f32[1,64], index: 6, kind: input, shape index: {}]   ;;  %s851_s7 = inlined_call_operand.hbm [shape: f32[16,64], index: 7, kind: output, shape index: {}]  }
   0x1   :  { %13 = vsyncpa [#allocation6], 0 }
   0x2   :  { %14 = vsyncpa [#allocation4], 0  ;;  %s21_s26 = sshll.u32 %s845_s1, 4  ;;  %s660_s27 = smov [#allocation2]   ;;  %s22_s26 = int_to_ptr.hbm [resolvable:$true] %s21_s26 }
   0x3   :  { %s23_s28 = sshll.u32 %s660_s27, 4  ;;  %s36_s8 = sshll.u32 %s847_s3, 4  ;;  %s24_s28 = int_to_ptr.vmem [resolvable:$true] %s23_s28  ;;  %s37_s8 = int_to_ptr.hbm [resolvable:$true] %s36_s8 }
   0x4   :  { %s661_s9 = smov 640   ;;  %s662_s10 = smov 40  }
   0x5   :  { %29 = dma.hbm_to_vmem [thread:$0]  %s22_s26, 10240, %s24_s28, [#allocation3], %s661_s9, %s661_s9, %s662_s10  }
   0x6   :  { %s663_s11 = smov [#allocation5]   ;;  %s664_s13 = smov 128  }
   0x7   :  { %s38_s12 = sshll.u32 %s663_s11, 4  ;;  %s665_s14 = smov 8   ;;  %s39_s12 = int_to_ptr.vmem [resolvable:$true] %s38_s12 }
   0x8   :  { %44 = dma.hbm_to_vmem [thread:$0]  %s37_s8, 4096, %s39_s12, [#allocation6], %s664_s13, %s664_s13, %s665_s14  }
   0x9   :  { %654 = dma.done.wait [#allocation3], 10240  }
   0xa   :  { %655 = vsyncadd [#allocation3], 4294957056 }
   0xb   :  { %656 = dma.done.wait [#allocation6], 4096  }
   0xc   :  { %657 = vsyncadd [#allocation6], 4294963200  ;;  %v61_v0 = vlaneseq  ;;  %v724_v8 = vld [vmem:[%s844_s0 + $0x8] sm:$0xff]  ;;  %v729_v9 = vld [vmem:[%s844_s0] sm:$0xff]  ;;  %v666_v10 = vmov 0.0   ;;  %vm100_vm3 = vcmask 130048  }
   0xd   :  { %121 = vmatpush.msra.mxu0 %v724_v8  ;;  %v208_v12 = vld [vmem:[#allocation2 + $0x258] sm:$0xff]  ;;  %v203_v13 = vld [vmem:[#allocation2 + $0x230] sm:$0xff]  ;;  %v198_v16 = vld [vmem:[#allocation2 + $0x208] sm:$0xff]  ;;  %vm519_vm12 = vcmask 523264   ;;  %s528_s30 = sshll.u32 %s851_s7, 4  ;;  %s529_s30 = int_to_ptr.hbm [resolvable:$true] %s528_s30 }
   0xe   :  { %v62_v1 = vshrl.u32 %v61_v0, 7  ;;  %v717_v2 = vand.u32 127, %v61_v0  ;;  %225 = vmatpush.msra.mxu1 %v208_v12  ;;  %v209_v17 = vld [vmem:[#allocation2 + $0x260] sm:$0xff]  ;;  %v210_v18 = vld [vmem:[#allocation2 + $0x268] sm:$0xff]  ;;  %v211_v19 = vld [vmem:[#allocation2 + $0x270] sm:$0xff] }
   0xf   :  { %122 = vmatpush.msra.mxu0 %v729_v9  ;;  %v193_v20 = vld [vmem:[#allocation2 + $0x1e0] sm:$0xff]  ;;  %248 = vmatpush.msra.mxu2 %v209_v17  ;;  %v204_v21 = vld [vmem:[#allocation2 + $0x238] sm:$0xff]  ;;  %v206_v23 = vld [vmem:[#allocation2 + $0x248] sm:$0xff] }
  0x10   :  { %v66_v3 = vsub.s32 %v62_v1, %v717_v2  ;;  %v74_v4 = vand.u32 7, %v62_v1  ;;  %v63_v5 = vadd.s32 8, %v62_v1  ;;  %226 = vmatpush.msra.mxu1 %v203_v13  ;;  %271 = vmatpush.msra.mxu3 %v210_v18  ;;  %v205_v22 = vld [vmem:[#allocation2 + $0x240] sm:$0xff]  ;;  %v199_v24 = vld [vmem:[#allocation2 + $0x210] sm:$0xff]  ;;  %v188_v25 = vld [vmem:[#allocation2 + $0x1b8] sm:$0xff]  ;;  %vm130_vm7 = vcmp.lt.s32.totalorder %v717_v2, 64 }
  0x11   :  { %294 = vmatpush.msrb.mxu0 %v211_v19  ;;  %249 = vmatpush.msra.mxu2 %v204_v21  ;;  %v200_v26 = vld [vmem:[#allocation2 + $0x218] sm:$0xff]  ;;  %v201_v27 = vld [vmem:[#allocation2 + $0x220] sm:$0xff]  ;;  %v194_v28 = vld [vmem:[#allocation2 + $0x1e8] sm:$0xff] }
  0x12   :  { %vm68_vm0 = vcmp.eq.s32.totalorder %v66_v3, 1  ;;  %vm94_vm1 = vcmp.ne.s32.totalorder %v74_v4, 0  ;;  %v67_v6 = vsub.s32 %v63_v5, %v717_v2  ;;  %v81_v7 = vand.u32 7, %v63_v5  ;;  %227 = vmatpush.msra.mxu1 %v198_v16  ;;  %272 = vmatpush.msra.mxu3 %v205_v22  ;;  %v195_v29 = vld [vmem:[#allocation2 + $0x1f0] sm:$0xff]  ;;  %v196_v32 = vld [vmem:[#allocation2 + $0x1f8] sm:$0xff]  ;;  %v189_v33 = vld [vmem:[#allocation2 + $0x1c0] sm:$0xff] }
  0x13   :  { %vm96_vm2 = vmand %vm68_vm0, %vm94_vm1  ;;  %295 = vmatpush.msrb.mxu0 %v206_v23  ;;  %v183_v31 = vld [vmem:[#allocation2 + $0x190] sm:$0xff]  ;;  %250 = vmatpush.msra.mxu2 %v199_v24  ;;  %v178_v34 = vld [vmem:[#allocation2 + $0x168] sm:$0xff] }
  0x14   :  { %v98_v11 = vsel %vm96_vm2, 1.0, %v666_v10  ;;  %vm733_vm4 = vcmp.eq.s32.totalorder %v67_v6, 1  ;;  %vm737_vm5 = vcmp.ne.s32.totalorder %v81_v7, 0  ;;  %228 = vmatpush.msra.mxu1 %v193_v20  ;;  %273 = vmatpush.msra.mxu3 %v200_v26  ;;  %v190_v35 = vld [vmem:[#allocation2 + $0x1c8] sm:$0xff]  ;;  %v191_v36 = vld [vmem:[#allocation2 + $0x1d0] sm:$0xff]  ;;  %v184_v37 = vld [vmem:[#allocation2 + $0x198] sm:$0xff] }
  0x15   :  { %542 = vmatmul.msk.f32.vlgmr.msra.gmra.mxu0 %vm100_vm3, %v98_v11  ;;  %vm97_vm6 = vmand %vm733_vm4, %vm737_vm5  ;;  %251 = vmatpush.msra.mxu2 %v194_v28  ;;  %v173_v38 = vld [vmem:[#allocation2 + $0x140] sm:$0xff]  ;;  %v186_v40 = vld [vmem:[#allocation2 + $0x1a8] sm:$0xff] }
  0x16   :  { %v99_v30 = vsel %vm97_vm6, 1.0, %v666_v10  ;;  %229 = vmatpush.msra.mxu1 %v188_v25  ;;  %296 = vmatpush.msrb.mxu0 %v201_v27  ;;  %v185_v39 = vld [vmem:[#allocation2 + $0x1a0] sm:$0xff]  ;;  %v179_v41 = vld [vmem:[#allocation2 + $0x170] sm:$0xff]  ;;  %v168_v42 = vld [vmem:[#allocation2 + $0x118] sm:$0xff] }
  0x17   :  { %274 = vmatpush.msra.mxu3 %v195_v29  ;;  %252 = vmatpush.msra.mxu2 %v189_v33  ;;  %v180_v43 = vld [vmem:[#allocation2 + $0x178] sm:$0xff]  ;;  %v181_v44 = vld [vmem:[#allocation2 + $0x180] sm:$0xff]  ;;  %v174_v45 = vld [vmem:[#allocation2 + $0x148] sm:$0xff] }
  0x18   :  { %230 = vmatpush.msra.mxu1 %v183_v31  ;;  %297 = vmatpush.msrb.mxu0 %v196_v32  ;;  %v163_v46 = vld [vmem:[#allocation2 + $0xf0] sm:$0xff]  ;;  %v176_v48 = vld [vmem:[#allocation2 + $0x158] sm:$0xff]  ;;  %v169_v49 = vld [vmem:[#allocation2 + $0x120] sm:$0xff] }
  0x19   :  { %275 = vmatpush.msra.mxu3 %v190_v35  ;;  %253 = vmatpush.msra.mxu2 %v184_v37  ;;  %v175_v47 = vld [vmem:[#allocation2 + $0x150] sm:$0xff]  ;;  %v158_v50 = vld [vmem:[#allocation2 + $0xc8] sm:$0xff]  ;;  %v164_v53 = vld [vmem:[#allocation2 + $0xf8] sm:$0xff] }
  0x1a   :  { %231 = vmatpush.msra.mxu1 %v178_v34  ;;  %298 = vmatpush.msrb.mxu0 %v191_v36  ;;  %v170_v51 = vld [vmem:[#allocation2 + $0x128] sm:$0xff]  ;;  %v171_v52 = vld [vmem:[#allocation2 + $0x130] sm:$0xff]  ;;  %v153_v54 = vld [vmem:[#allocation2 + $0xa0] sm:$0xff] }
  0x1b   :  { %276 = vmatpush.msra.mxu3 %v185_v39  ;;  %254 = vmatpush.msra.mxu2 %v179_v41  ;;  %v165_v55 = vld [vmem:[#allocation2 + $0x100] sm:$0xff]  ;;  %v166_v56 = vld [vmem:[#allocation2 + $0x108] sm:$0xff]  ;;  %v159_v57 = vld [vmem:[#allocation2 + $0xd0] sm:$0xff] }
  0x1c   :  { %232 = vmatpush.msra.mxu1 %v173_v38  ;;  %299 = vmatpush.msrb.mxu0 %v186_v40  ;;  %v148_v58 = vld [vmem:[#allocation2 + $0x78] sm:$0xff]  ;;  %v161_v60 = vld [vmem:[#allocation2 + $0xe0] sm:$0xff]  ;;  %v154_v61 = vld [vmem:[#allocation2 + $0xa8] sm:$0xff] }
  0x1d   :  { %543 = vmatmul.msk.f32.gmra.mxu0 %vm100_vm3, %v99_v30  ;;  %277 = vmatpush.msra.mxu3 %v180_v43  ;;  %v160_v59 = vld [vmem:[#allocation2 + $0xd8] sm:$0xff]  ;;  %v143_v62 = vld [vmem:[#allocation2 + $0x50] sm:$0xff]  ;;  %v149_v1 = vld [vmem:[#allocation2 + $0x80] sm:$0xff] }
  0x1e   :  { %233 = vmatpush.msra.mxu1 %v168_v42  ;;  %300 = vmatpush.msrb.mxu0 %v181_v44  ;;  %v155_v63 = vld [vmem:[#allocation2 + $0xb0] sm:$0xff]  ;;  %v156_v0 = vld [vmem:[#allocation2 + $0xb8] sm:$0xff]  ;;  %v138_v3 = vld [vmem:[#allocation2 + $0x28] sm:$0xff] }
  0x1f   :  { %255 = vmatpush.msra.mxu2 %v174_v45  ;;  %278 = vmatpush.msra.mxu3 %v175_v47  ;;  %v150_v4 = vld [vmem:[#allocation2 + $0x88] sm:$0xff]  ;;  %v151_v5 = vld [vmem:[#allocation2 + $0x90] sm:$0xff]  ;;  %v144_v6 = vld [vmem:[#allocation2 + $0x58] sm:$0xff] }
  0x20   :  { %234 = vmatpush.msra.mxu1 %v163_v46  ;;  %301 = vmatpush.msrb.mxu0 %v176_v48  ;;  %v133_v7 = vld [vmem:[#allocation2] sm:$0xff]  ;;  %v212_v11 = vld [vmem:[#allocation2 + $0x278] sm:$0xff]  ;;  %v146_v12 = vld [vmem:[#allocation2 + $0x68] sm:$0xff] }
  0x21   :  { %256 = vmatpush.msra.mxu2 %v169_v49  ;;  %279 = vmatpush.msra.mxu3 %v170_v51  ;;  %v145_v10 = vld [vmem:[#allocation2 + $0x60] sm:$0xff]  ;;  %v139_v13 = vld [vmem:[#allocation2 + $0x30] sm:$0xff]  ;;  %v140_v14 = vld [vmem:[#allocation2 + $0x38] sm:$0xff] }
  0x22   :  { %235 = vmatpush.msra.mxu1 %v158_v50  ;;  %302 = vmatpush.msrb.mxu0 %v171_v52  ;;  %v207_v15 = vld [vmem:[#allocation2 + $0x250] sm:$0xff]  ;;  %v141_v16 = vld [vmem:[#allocation2 + $0x40] sm:$0xff]  ;;  %v202_v17 = vld [vmem:[#allocation2 + $0x228] sm:$0xff] }
  0x23   :  { %257 = vmatpush.msra.mxu2 %v164_v53  ;;  %280 = vmatpush.msra.mxu3 %v165_v55  ;;  %v197_v18 = vld [vmem:[#allocation2 + $0x200] sm:$0xff]  ;;  %v192_v19 = vld [vmem:[#allocation2 + $0x1d8] sm:$0xff]  ;;  %v187_v20 = vld [vmem:[#allocation2 + $0x1b0] sm:$0xff] }
  0x24   :  { %236 = vmatpush.msra.mxu1 %v153_v54  ;;  %303 = vmatpush.msrb.mxu0 %v166_v56  ;;  %v182_v21 = vld [vmem:[#allocation2 + $0x188] sm:$0xff]  ;;  %v135_v23 = vld [vmem:[#allocation2 + $0x10] sm:$0xff]  ;;  %v136_v24 = vld [vmem:[#allocation2 + $0x18] sm:$0xff] }
  0x25   :  { %258 = vmatpush.msra.mxu2 %v159_v57  ;;  %281 = vmatpush.msra.mxu3 %v160_v59  ;;  %v134_v22 = vld [vmem:[#allocation2 + $0x8] sm:$0xff]  ;;  %v177_v25 = vld [vmem:[#allocation2 + $0x160] sm:$0xff]  ;;  %v172_v26 = vld [vmem:[#allocation2 + $0x138] sm:$0xff] }
  0x26   :  { %237 = vmatpush.msra.mxu1 %v148_v58  ;;  %304 = vmatpush.msrb.mxu0 %v161_v60  ;;  %v167_v27 = vld [vmem:[#allocation2 + $0x110] sm:$0xff]  ;;  %v162_v28 = vld [vmem:[#allocation2 + $0xe8] sm:$0xff]  ;;  %v157_v29 = vld [vmem:[#allocation2 + $0xc0] sm:$0xff] }
  0x27   :  { %259 = vmatpush.msra.mxu2 %v154_v61  ;;  %282 = vmatpush.msra.mxu3 %v155_v63  ;;  %v152_v30 = vld [vmem:[#allocation2 + $0x98] sm:$0xff]  ;;  %v147_v31 = vld [vmem:[#allocation2 + $0x70] sm:$0xff]  ;;  %v142_v32 = vld [vmem:[#allocation2 + $0x48] sm:$0xff] }
  0x28   :  { %238 = vmatpush.msra.mxu1 %v143_v62  ;;  %305 = vmatpush.msrb.mxu0 %v156_v0  ;;  %v137_v33 = vld [vmem:[#allocation2 + $0x20] sm:$0xff]  ;;  %v399_v38 = vld [vmem:[#allocation5 + $0x78] sm:$0xff]  ;;  %v398_v39 = vld [vmem:[#allocation5 + $0x70] sm:$0xff] }
  0x29   :  { %260 = vmatpush.msra.mxu2 %v149_v1  ;;  %283 = vmatpush.msra.mxu3 %v150_v4  ;;  %v397_v2 = vld [vmem:[#allocation5 + $0x68] sm:$0xff]  ;;  %v415_v40 = vld [vmem:[#allocation5 + $0xf8] sm:$0xff]  ;;  %v414_v42 = vld [vmem:[#allocation5 + $0xf0] sm:$0xff] }
  0x2a   :  { %239 = vmatpush.msra.mxu1 %v138_v3  ;;  %306 = vmatpush.msrb.mxu0 %v151_v5  ;;  %v395_v41 = vld [vmem:[#allocation5 + $0x58] sm:$0xff]  ;;  %v413_v43 = vld [vmem:[#allocation5 + $0xe8] sm:$0xff]  ;;  %v412_v45 = vld [vmem:[#allocation5 + $0xe0] sm:$0xff] }
  0x2b   :  { %261 = vmatpush.msra.mxu2 %v144_v6  ;;  %284 = vmatpush.msra.mxu3 %v145_v10  ;;  %v393_v44 = vld [vmem:[#allocation5 + $0x48] sm:$0xff]  ;;  %v392_v46 = vld [vmem:[#allocation5 + $0x40] sm:$0xff]  ;;  %v411_v47 = vld [vmem:[#allocation5 + $0xd8] sm:$0xff] }
  0x2c   :  { %240 = vmatpush.msra.mxu1 %v133_v7  ;;  %307 = vmatpush.msrb.mxu0 %v146_v12  ;;  %v391_v48 = vld [vmem:[#allocation5 + $0x38] sm:$0xff]  ;;  %v410_v49 = vld [vmem:[#allocation5 + $0xd0] sm:$0xff]  ;;  %v409_v51 = vld [vmem:[#allocation5 + $0xc8] sm:$0xff] }
  0x2d   :  { %262 = vmatpush.msra.mxu2 %v139_v13  ;;  %285 = vmatpush.msra.mxu3 %v140_v14  ;;  %v390_v50 = vld [vmem:[#allocation5 + $0x30] sm:$0xff]  ;;  %v753_v52 = vld [vmem:[%s846_s2] sm:$0x1f]  ;;  %v389_v53 = vld [vmem:[#allocation5 + $0x28] sm:$0xff] }
  0x2e   :  { %317 = vmatpush.msrb.mxu1 %v212_v11  ;;  %308 = vmatpush.msrb.mxu0 %v141_v16  ;;  %v408_v54 = vld [vmem:[#allocation5 + $0xc0] sm:$0xff]  ;;  %v215_v55 = vperm.slane %v753_v52, 0  ;;  %v407_v57 = vld [vmem:[#allocation5 + $0xb8] sm:$0xff]  ;;  %v406_v59 = vld [vmem:[#allocation5 + $0xb0] sm:$0xff]  ;;  %v216_v1 = vperm.slane %v753_v52, 1 }
  0x2f   :  { %263 = vmatpush.msra.mxu2 %v134_v22  ;;  %286 = vmatpush.msra.mxu3 %v135_v23  ;;  %v388_v56 = vld [vmem:[#allocation5 + $0x20] sm:$0xff]  ;;  %v387_v58 = vld [vmem:[#allocation5 + $0x18] sm:$0xff]  ;;  %v386_v62 = vld [vmem:[#allocation5 + $0x10] sm:$0xff] }
  0x30   :  { %318 = vmatpush.msrb.mxu1 %v207_v15  ;;  %309 = vmatpush.msrb.mxu0 %v136_v24  ;;  %v405_v63 = vld [vmem:[#allocation5 + $0xa8] sm:$0xff]  ;;  %v404_v4 = vld [vmem:[#allocation5 + $0xa0] sm:$0xff]  ;;  %v403_v7 = vld [vmem:[#allocation5 + $0x98] sm:$0xff] }
  0x31   :  { %420 = vmatpush.msrb.mxu2 %v399_v38  ;;  %443 = vmatpush.msrb.mxu3 %v415_v40  ;;  %v385_v3 = vld [vmem:[#allocation5 + $0x8] sm:$0xff]  ;;  %v384_v6 = vld [vmem:[#allocation5] sm:$0xff]  ;;  %v402_v12 = vld [vmem:[#allocation5 + $0x90] sm:$0xff] }
  0x32   :  { %319 = vmatpush.msrb.mxu1 %v202_v17  ;;  %v401_v14 = vld [vmem:[#allocation5 + $0x88] sm:$0xff]  ;;  %v400_v17 = vld [vmem:[#allocation5 + $0x80] sm:$0xff]  ;;  %v487_v38 = vld [vmem:[%s849_s5 + $0x58] sm:$0xff] }
  0x33   :  { %421 = vmatpush.msrb.mxu2 %v398_v39  ;;  %444 = vmatpush.msrb.mxu3 %v414_v42 }
  0x34   :  { %320 = vmatpush.msrb.mxu1 %v197_v18 }
  0x35   :  { %422 = vmatpush.msrb.mxu2 %v397_v2  ;;  %445 = vmatpush.msrb.mxu3 %v413_v43  ;;  %v486_v2 = vld [vmem:[%s849_s5 + $0x50] sm:$0xff]  ;;  %v485_v43 = vld [vmem:[%s849_s5 + $0x48] sm:$0xff] }
  0x36   :  { %321 = vmatpush.msrb.mxu1 %v192_v19 }
  0x37   :  { %446 = vmatpush.msrb.mxu3 %v412_v45 }
  0x38   :  { %322 = vmatpush.msrb.mxu1 %v187_v20 }
  0x39   :  { %447 = vmatpush.msrb.mxu3 %v411_v47  ;;  %v484_v47 = vld [vmem:[%s849_s5 + $0x40] sm:$0xff] }
  0x3a   :  { %323 = vmatpush.msrb.mxu1 %v182_v21 }
  0x3b   :  { %448 = vmatpush.msrb.mxu3 %v410_v49 }
  0x3c   :  { %324 = vmatpush.msrb.mxu1 %v177_v25 }
  0x3d   :  { %449 = vmatpush.msrb.mxu3 %v409_v51 }
  0x3e   :  { %325 = vmatpush.msrb.mxu1 %v172_v26 }
  0x3f   :  { %450 = vmatpush.msrb.mxu3 %v408_v54 }
  0x40   :  { %326 = vmatpush.msrb.mxu1 %v167_v27 }
  0x41   :  { %451 = vmatpush.msrb.mxu3 %v407_v57  ;;  %v482_v57 = vld [vmem:[%s849_s5 + $0x30] sm:$0xff] }
  0x42   :  { %327 = vmatpush.msrb.mxu1 %v162_v28  ;;  %v491_v28 = vld [vmem:[%s849_s5 + $0x78] sm:$0xff] }
  0x43   :  { %452 = vmatpush.msrb.mxu3 %v406_v59  ;;  %496 = vmatpush.msra.mxu0 %v491_v28 }
  0x44   :  { %328 = vmatpush.msrb.mxu1 %v157_v29  ;;  %v490_v29 = vld [vmem:[%s849_s5 + $0x70] sm:$0xff] }
  0x45   :  { %453 = vmatpush.msrb.mxu3 %v405_v63  ;;  %497 = vmatpush.msra.mxu0 %v490_v29  ;;  %v552_v29 = vld [vmem:[%s848_s4] ss:$0 sm:$0xff]  ;;  %s667_s4 = smov [#allocation7]  }
  0x46   :  { %329 = vmatpush.msrb.mxu1 %v152_v30  ;;  %s526_s27 = sshll.u32 %s667_s4, 4  ;;  %s527_s27 = int_to_ptr.vmem [resolvable:$true] %s526_s27 }
  0x47   :  { %454 = vmatpush.msrb.mxu3 %v404_v4 }
  0x48   :  { %330 = vmatpush.msrb.mxu1 %v147_v31 }
  0x49   :  { %455 = vmatpush.msrb.mxu3 %v403_v7 }
  0x4a   :  { %331 = vmatpush.msrb.mxu1 %v142_v32  ;;  %v489_v32 = vld [vmem:[%s849_s5 + $0x68] sm:$0xff] }
  0x4b   :  { %456 = vmatpush.msrb.mxu3 %v402_v12  ;;  %498 = vmatpush.msra.mxu0 %v489_v32 }
  0x4c   :  { %332 = vmatpush.msrb.mxu1 %v137_v33 }
  0x4d   :  { %457 = vmatpush.msrb.mxu3 %v401_v14 }
  0x4f   :  { %458 = vmatpush.msrb.mxu3 %v400_v17  ;;  %v478_v17 = vld [vmem:[%s849_s5 + $0x10] sm:$0xff] }
  0x92   :  { %v124_v34 = vpop.f32.mrf.mxu0 }
  0x93   :  { %v131_v35 = vsel %vm130_vm7, %v124_v34, %v729_v9  ;;  %v396_v9 = vld [vmem:[#allocation5 + $0x60] sm:$0xff] }
  0x94   :  { %241 = vmatmul.f32.vlgmr.msra.gmra.mxu1 %v131_v35  ;;  %264 = vmatmul.f32.vlgmr.msra.gmra.mxu2 %v131_v35 }
  0x95   :  { %287 = vmatmul.f32.vlgmr.msra.gmra.mxu3 %v131_v35  ;;  %310 = vmatmul.f32.vlgmr.msrb.gmra.mxu0 %v131_v35 }
  0x96   :  { %423 = vmatpush.msrb.mxu2 %v396_v9 }
  0x98   :  { %424 = vmatpush.msrb.mxu2 %v395_v41 }
  0x9a   :  { %v127_v36 = vpop.f32.mrf.mxu0 }
  0x9b   :  { %v132_v37 = vsel %vm130_vm7, %v127_v36, %v724_v8  ;;  %v394_v8 = vld [vmem:[#allocation5 + $0x50] sm:$0xff]  ;;  %v488_v36 = vld [vmem:[%s849_s5 + $0x60] sm:$0xff] }
  0x9c   :  { %244 = vmatmul.f32.gmra.mxu1 %v132_v37  ;;  %267 = vmatmul.f32.gmra.mxu2 %v132_v37 }
  0x9d   :  { %290 = vmatmul.f32.gmra.mxu3 %v132_v37  ;;  %313 = vmatmul.f32.gmra.mxu0 %v132_v37 }
  0x9e   :  { %425 = vmatpush.msrb.mxu2 %v394_v8  ;;  %499 = vmatpush.msra.mxu0 %v488_v36  ;;  %v217_v8 = vperm.slane %v753_v52, 2 }
  0xa0   :  { %426 = vmatpush.msrb.mxu2 %v393_v44  ;;  %500 = vmatpush.msra.mxu0 %v487_v38 }
  0xa2   :  { %427 = vmatpush.msrb.mxu2 %v392_v46  ;;  %501 = vmatpush.msra.mxu0 %v486_v2 }
  0xa4   :  { %333 = vmatmul.f32.vlgmr.msrb.gmra.mxu1 %v131_v35  ;;  %428 = vmatpush.msrb.mxu2 %v391_v48 }
  0xa5   :  { %502 = vmatpush.msra.mxu0 %v485_v43 }
  0xa6   :  { %429 = vmatpush.msrb.mxu2 %v390_v50 }
  0xa7   :  { %503 = vmatpush.msra.mxu0 %v484_v47 }
  0xa8   :  { %430 = vmatpush.msrb.mxu2 %v389_v53  ;;  %v483_v53 = vld [vmem:[%s849_s5 + $0x38] sm:$0xff] }
  0xa9   :  { %504 = vmatpush.msra.mxu0 %v483_v53 }
  0xaa   :  { %431 = vmatpush.msrb.mxu2 %v388_v56 }
  0xab   :  { %505 = vmatpush.msra.mxu0 %v482_v57 }
  0xac   :  { %336 = vmatmul.f32.gmra.mxu1 %v132_v37  ;;  %432 = vmatpush.msrb.mxu2 %v387_v58 }
  0xae   :  { %433 = vmatpush.msrb.mxu2 %v386_v62 }
  0xb0   :  { %434 = vmatpush.msrb.mxu2 %v385_v3 }
  0xb2   :  { %435 = vmatpush.msrb.mxu2 %v384_v6 }
 0x111   :  { %v242_v60 = vpop.f32.mrf.mxu1 }
 0x112   :  { %v756_v61 = vadd.f32 %v242_v60, %v215_v55  ;;  %v311_v54 = vpop.f32.mrf.mxu0 }
 0x114   :  { %v344_v0 = vmin.f32 %v756_v61, 20.0  ;;  %vm340_vm8 = vcmp.gt.f32.partialorder %v756_v61, 20.0 }
 0x116   :  { %v348_v5 = vmul.f32 1.442695, %v344_v0 }
 0x117   :  { %v265_v10 = vpop.f32.mrf.mxu2 }
 0x118   :  { %554 = vpow2.f32 %v348_v5  ;;  %v760_v11 = vadd.f32 %v265_v10, %v216_v1  ;;  %v288_v40 = vpop.f32.mrf.mxu3 }
 0x119   :  { %v245_v13 = vpop.f32.mrf.mxu1  ;;  %v289_v49 = vadd.f32 %v288_v40, %v217_v8 }
 0x11a   :  { %v345_v15 = vmin.f32 %v760_v11, 20.0  ;;  %v763_v16 = vadd.f32 %v245_v13, %v215_v55  ;;  %vm341_vm9 = vcmp.gt.f32.partialorder %v760_v11, 20.0  ;;  %v218_v55 = vperm.slane %v753_v52, 3  ;;  %v314_v7 = vpop.f32.mrf.mxu0 }
 0x11c   :  { %v350_v18 = vmul.f32 1.442695, %v345_v15  ;;  %v346_v19 = vmin.f32 %v763_v16, 20.0  ;;  %vm342_vm10 = vcmp.gt.f32.partialorder %v763_v16, 20.0  ;;  %v312_v62 = vadd.f32 %v311_v54, %v218_v55  ;;  %v480_v15 = vld [vmem:[%s849_s5 + $0x20] sm:$0xff] }
 0x11d   :  { %v315_v12 = vadd.f32 %v314_v7, %v218_v55 }
 0x11e   :  { %v555_v20 = vpop.eup %554  ;;  %556 = vpow2.f32 %v350_v18  ;;  %v352_v21 = vmul.f32 1.442695, %v346_v19  ;;  %v477_v18 = vld [vmem:[%s849_s5 + $0x8] sm:$0xff]  ;;  %v476_v19 = vld [vmem:[%s849_s5] sm:$0xff] }
 0x11f   :  { %v356_v22 = vadd.f32 1.0, %v555_v20  ;;  %v268_v23 = vpop.f32.mrf.mxu2 }
 0x120   :  { %558 = vpow2.f32 %v352_v21  ;;  %v766_v24 = vadd.f32 %v268_v23, %v216_v1  ;;  %v219_v21 = vperm.slane %v753_v52, 4 }
 0x121   :  { %560 = vlog2.f32 %v356_v22  ;;  %v334_v20 = vpop.f32.mrf.mxu1 }
 0x122   :  { %v347_v25 = vmin.f32 %v766_v24, 20.0  ;;  %vm343_vm11 = vcmp.gt.f32.partialorder %v766_v24, 20.0  ;;  %v335_v22 = vadd.f32 %v334_v20, %v219_v21 }
 0x124   :  { %v557_v26 = vpop.eup %556  ;;  %v354_v27 = vmul.f32 1.442695, %v347_v25  ;;  %v466_v23 = vmul.f32 0.5, %v335_v22 }
 0x125   :  { %v357_v30 = vadd.f32 1.0, %v557_v26 }
 0x126   :  { %v559_v31 = vpop.eup %558  ;;  %562 = vpow2.f32 %v354_v27 }
 0x127   :  { %v561_v33 = vpop.eup %560  ;;  %564 = vlog2.f32 %v357_v30  ;;  %v358_v34 = vadd.f32 1.0, %v559_v31 }
 0x128   :  { %v361_v35 = vmul.f32 0.6931472, %v561_v33 }
 0x129   :  { %566 = vlog2.f32 %v358_v34 }
 0x12a   :  { %v368_v37 = vsel %vm340_vm8, %v756_v61, %v361_v35 }
 0x12b   :  { %568 = vtanh.f32 %v368_v37 }
 0x12c   :  { %v563_v39 = vpop.eup %562 }
 0x12d   :  { %v565_v9 = vpop.eup %564  ;;  %v359_v41 = vadd.f32 1.0, %v563_v39 }
 0x12e   :  { %v363_v42 = vmul.f32 0.6931472, %v565_v9 }
 0x12f   :  { %v567_v44 = vpop.eup %566  ;;  %570 = vlog2.f32 %v359_v41  ;;  %v553_v41 = vld [vmem:[%s850_s6] ss:$0 sm:$0xff] }
 0x130   :  { %v369_v45 = vsel %vm341_vm9, %v760_v11, %v363_v42  ;;  %v365_v46 = vmul.f32 0.6931472, %v567_v44 }
 0x131   :  { %v569_v48 = vpop.eup %568  ;;  %572 = vtanh.f32 %v369_v45 }
 0x132   :  { %v376_v50 = vmul.f32 %v569_v48, %v756_v61  ;;  %v370_v51 = vsel %vm342_vm10, %v763_v16, %v365_v46  ;;  %v291_v61 = vpop.f32.mrf.mxu3 }
 0x133   :  { %574 = vtanh.f32 %v370_v51  ;;  %v292_v3 = vadd.f32 %v291_v61, %v217_v8 }
 0x134   :  { %v380_v56 = vmul.f32 %v376_v50, %v289_v49 }
 0x135   :  { %v571_v58 = vpop.eup %570 }
 0x136   :  { %v367_v59 = vmul.f32 0.6931472, %v571_v58  ;;  %436 = vmatmul.f32.vlgmr.msrb.gmra.mxu2 %v380_v56 }
 0x137   :  { %v573_v60 = vpop.eup %572 }
 0x138   :  { %v371_v63 = vsel %vm343_vm11, %v766_v24, %v367_v59  ;;  %v377_v0 = vmul.f32 %v573_v60, %v760_v11  ;;  %v481_v11 = vld [vmem:[%s849_s5 + $0x28] sm:$0xff] }
 0x139   :  { %v575_v1 = vpop.eup %574  ;;  %576 = vtanh.f32 %v371_v63  ;;  %506 = vmatpush.msra.mxu0 %v481_v11 }
 0x13a   :  { %v381_v4 = vmul.f32 %v377_v0, %v312_v62  ;;  %v378_v5 = vmul.f32 %v575_v1, %v763_v16  ;;  %v479_v16 = vld [vmem:[%s849_s5 + $0x18] sm:$0xff]  ;;  %578 = vtanh.f32 %v466_v23 }
 0x13b   :  { %507 = vmatpush.msra.mxu0 %v480_v15 }
 0x13c   :  { %459 = vmatmul.f32.vlgmr.msrb.gmra.mxu3 %v381_v4  ;;  %v382_v6 = vmul.f32 %v378_v5, %v292_v3 }
 0x13d   :  { %508 = vmatpush.msra.mxu0 %v479_v16 }
 0x13e   :  { %439 = vmatmul.f32.gmra.mxu2 %v382_v6 }
 0x13f   :  { %v577_v10 = vpop.eup %576  ;;  %509 = vmatpush.msra.mxu0 %v478_v17 }
 0x140   :  { %v379_v13 = vmul.f32 %v577_v10, %v766_v24  ;;  %v337_v24 = vpop.f32.mrf.mxu1  ;;  %v579_v27 = vpop.eup %578 }
 0x141   :  { %510 = vmatpush.msra.mxu0 %v477_v18  ;;  %v338_v25 = vadd.f32 %v337_v24, %v219_v21  ;;  %v470_v30 = vadd.f32 1.0, %v579_v27 }
 0x142   :  { %v383_v14 = vmul.f32 %v379_v13, %v315_v12 }
 0x143   :  { %511 = vmatpush.msra.mxu0 %v476_v19  ;;  %v467_v26 = vmul.f32 0.5, %v338_v25  ;;  %v472_v33 = vmul.f32 0.5, %v470_v30 }
 0x144   :  { %462 = vmatmul.f32.gmra.mxu3 %v383_v14 }
 0x145   :  { %580 = vtanh.f32 %v467_v26 }
 0x14b   :  { %v581_v35 = vpop.eup %580 }
 0x14c   :  { %v471_v37 = vadd.f32 1.0, %v581_v35 }
 0x14e   :  { %v473_v9 = vmul.f32 0.5, %v471_v37 }
 0x1b9   :  { %v437_v28 = vpop.f32.mrf.mxu2 }
 0x1ba   :  { %v438_v31 = vadd.f32 %v552_v29, %v437_v28 }
 0x1bf   :  { %v460_v32 = vpop.f32.mrf.mxu3 }
 0x1c0   :  { %v461_v34 = vadd.f32 %v460_v32, %v438_v31 }
 0x1c1   :  { %v440_v36 = vpop.f32.mrf.mxu2 }
 0x1c2   :  { %v474_v52 = vmul.f32 %v472_v33, %v461_v34  ;;  %v441_v38 = vadd.f32 %v552_v29, %v440_v36 }
 0x1c4   :  { %512 = vmatmul.f32.vlgmr.msra.gmra.mxu0 %v474_v52 }
 0x1c7   :  { %v463_v39 = vpop.f32.mrf.mxu3 }
 0x1c8   :  { %v464_v2 = vadd.f32 %v463_v39, %v441_v38 }
 0x1ca   :  { %v475_v40 = vmul.f32 %v473_v9, %v464_v2 }
 0x1cc   :  { %515 = vmatmul.f32.gmra.mxu0 %v475_v40 }
 0x241   :  { %v513_v42 = vpop.f32.mrf.mxu0 }
 0x242   :  { %v514_v8 = vadd.f32 %v553_v41, %v513_v42 }
 0x244   :  { %520 = vst.msk [vmem:[#allocation7] sm:$0xff] %vm519_vm12, %v514_v8 }
 0x249   :  { %v516_v43 = vpop.f32.mrf.mxu0 }
 0x24a   :  { %v517_v44 = vadd.f32 %v553_v41, %v516_v43 }
 0x24c   :  { %521 = vst.msk [vmem:[#allocation7 + $0x8] sm:$0xff] %vm519_vm12, %v517_v44 }
 0x24d   :  { %534 = dma.vmem_to_hbm [thread:$0]  %s527_s27, 256, %s529_s30, [#allocation4], %s664_s13, %s664_s13, %s665_s14  }
 0x24e   :  { %658 = dma.done.wait [#allocation4], 256  }
 0x24f   :  { %659 = vsyncadd [#allocation4], 4294967040 }
 0x250   :  { %539 = vsyncpa [#allocation3], 1 }
 0x251   :  { %540 = vsyncpa [#allocation6], 1 }
 0x252   :  { %541 = vsyncpa [#allocation4], 1 }

</bundles_post_ra>
